<compile_context>
chip_gen: v7x
topology: tpu7x:2x2x1
jax: 0.10.0
libtpu: 0.0.40
codegen_flags: <defaults>
</compile_context>

<pallas_src>
import functools

import jax
import jax.numpy as jnp
from jax import lax
from jax.experimental import pallas as pl
from jax.experimental.pallas import tpu as pltpu

# Finite "minus infinity" for table padding: 0 * _NEG_PAD == 0, so the one-hot
# matmul stays NaN-free, and exp(-1e30 - m) underflows cleanly in f32.
# Do NOT change this to -inf and do NOT run the matmul/exp in fp16.
_NEG_PAD = -1e30
_LANE = 128
_SUBLANE = 8


def _round_up(x, m):
    return (x + m - 1) // m * m


def _block_params(n, block_n):
    # v7x has 2 TensorCores per chip: keep >= 2 blocks whenever possible so
    # the "parallel" grid axis actually splits across both cores.
    bn = min(block_n, max(_SUBLANE, _round_up(pl.cdiv(n, 2), _SUBLANE)))
    n_padded = _round_up(n, bn)
    return bn, n_padded, n_padded // bn


def _pad_table(table, vp):
    v = table.shape[0]
    tp = jnp.full((vp, vp), _NEG_PAD, dtype=jnp.float32)
    return tp.at[:v, :v].set(table.astype(jnp.float32))


def _pad_rows(x_flat, n_padded):
    n = x_flat.shape[0]
    return jnp.zeros((n_padded, 1), jnp.int32).at[:n, 0].set(x_flat.astype(jnp.int32))


# --------------------------------------------------------------------------
# Kernel bodies
# --------------------------------------------------------------------------

def _lookup_logits(idx, table_ref, bn, vp):
    """Embedding lookup as one-hot(idx) @ table on the MXU (lane-dense Vp)."""
    col = lax.broadcasted_iota(jnp.int32, (bn, vp), 1)        # (bn, Vp)
    onehot = (idx == col).astype(jnp.float32)                 # (bn, Vp)
    # HIGHEST precision: one-hot row selection must not round table values
    # through a reduced-precision MXU pass (MXU has enormous slack here).
    logits = jnp.dot(onehot, table_ref[...],
                     preferred_element_type=jnp.float32,
                     precision=lax.Precision.HIGHEST)         # (bn, Vp) f32
    return logits, col


def _xent_block_sum(logits, tgt, col, block_start, n_valid):
    """Sum of per-row cross entropy over this block; padded rows masked to 0."""
    bn = logits.shape[0]
    m = jnp.max(logits, axis=-1, keepdims=True)                          # (bn,1)
    lse = m + jnp.log(jnp.sum(jnp.exp(logits - m), axis=-1, keepdims=True))
    picked = jnp.sum(jnp.where(tgt == col, logits, 0.0), axis=-1, keepdims=True)
    per_example = lse - picked                                           # (bn,1)
    row = block_start + lax.broadcasted_iota(jnp.int32, (bn, 1), 0)
    masked = jnp.where(row < n_valid, per_example, 0.0)
    return jnp.sum(masked, axis=0, keepdims=True)                        # (1,1)


def _logits_kernel(idx_ref, table_ref, logits_ref):
    """Inference path: lookup only (no EUP exp / XLU reductions / no targets)."""
    bn = logits_ref.shape[0]
    vp = table_ref.shape[1]
    logits, _ = _lookup_logits(idx_ref[...], table_ref, bn, vp)
    logits_ref[...] = logits.astype(logits_ref.dtype)


def _logits_loss_kernel(idx_ref, tgt_ref, table_ref, logits_ref, loss_ref, *,
                        n_valid):
    """Training path that also materializes logits."""
    bn = logits_ref.shape[0]
    vp = table_ref.shape[1]
    logits, col = _lookup_logits(idx_ref[...], table_ref, bn, vp)
    logits_ref[...] = logits.astype(logits_ref.dtype)
    blk = _xent_block_sum(logits, tgt_ref[...], col,
                          pl.program_id(0) * bn, n_valid)
    # One aligned (8, 128) tile per block holding the block's loss sum
    # (broadcast); wrapper reads element [0, 0] of each tile.
    loss_ref[...] = jnp.broadcast_to(blk, loss_ref.shape)


def _loss_only_kernel(idx_ref, tgt_ref, table_ref, loss_ref, *, n_valid):
    """Training path when only the loss is consumed: no logits HBM store."""
    bn = idx_ref.shape[0]
    vp = table_ref.shape[1]
    logits, col = _lookup_logits(idx_ref[...], table_ref, bn, vp)
    blk = _xent_block_sum(logits, tgt_ref[...], col,
                          pl.program_id(0) * bn, n_valid)
    loss_ref[...] = jnp.broadcast_to(blk, loss_ref.shape)


# --------------------------------------------------------------------------
# Wrappers
# --------------------------------------------------------------------------

def _compiler_params():
    return pltpu.CompilerParams(
        dimension_semantics=("parallel",),
        vmem_limit_bytes=32 * 1024 * 1024,   # headroom for block_n sweeps
    )


def bigram_forward(idx, table, targets=None, *, block_n=2048,
                   pad_vocab=False, logits_dtype=jnp.float32):
    """JAX/Pallas equivalent of BigramLanguageModel.forward.

    idx:     (B, T) int token ids
    table:   (V, V) float32 embedding table
    targets: optional (B, T) int
    pad_vocab=True returns (B, T, Vp=128) logits with no narrowing copy
    (columns >= V hold -1e30); pad_vocab=False returns exact (B, T, V).
    Returns (logits, loss-or-None).
    """
    B, T = idx.shape
    V = table.shape[0]
    N = B * T
    Vp = _round_up(V, _LANE)
    bn, Np, grid_n = _block_params(N, block_n)

    table_p = _pad_table(table, Vp)
    idx_p = _pad_rows(idx.reshape(N), Np)

    row_spec = pl.BlockSpec((bn, 1), lambda i: (i, 0))
    # Constant index_map: table stays VMEM-resident across the grid; Pallas
    # does not re-issue the DMA for an unchanged block index.
    table_spec = pl.BlockSpec((Vp, Vp), lambda i: (0, 0))
    logits_spec = pl.BlockSpec((bn, Vp), lambda i: (i, 0))

    def narrow(logits_p):
        if pad_vocab:
            # No column-narrowing pass over the logits.  Row trim only if N
            # was padded up to a block multiple.
            lp = logits_p if Np == N else logits_p[:N]
            return lp.reshape(B, T, Vp)
        return logits_p[:N, :V].reshape(B, T, V)

    if targets is None:
        logits_p = pl.pallas_call(
            _logits_kernel,
            out_shape=jax.ShapeDtypeStruct((Np, Vp), logits_dtype),
            grid=(grid_n,),
            in_specs=[row_spec, table_spec],
            out_specs=logits_spec,
            compiler_params=_compiler_params(),
        )(idx_p, table_p)
        return narrow(logits_p), None

    tgt_p = _pad_rows(targets.reshape(N), Np)
    loss_spec = pl.BlockSpec((_SUBLANE, _LANE), lambda i: (i, 0))

    logits_p, loss_tiles = pl.pallas_call(
        functools.partial(_logits_loss_kernel, n_valid=N),
        out_shape=(
            jax.ShapeDtypeStruct((Np, Vp), logits_dtype),
            jax.ShapeDtypeStruct((grid_n * _SUBLANE, _LANE), jnp.float32),
        ),
        grid=(grid_n,),
        in_specs=[row_spec, row_spec, table_spec],
        out_specs=(logits_spec, loss_spec),
        compiler_params=_compiler_params(),
    )(idx_p, tgt_p, table_p)

    block_sums = loss_tiles.reshape(grid_n, _SUBLANE, _LANE)[:, 0, 0]
    loss = jnp.sum(block_sums) / jnp.float32(N)
    return narrow(logits_p), loss


def bigram_loss(idx, table, targets, *, block_n=2048):
    """Loss-only training path: never materializes the (Np, Vp) logits."""
    B, T = idx.shape
    V = table.shape[0]
    N = B * T
    Vp = _round_up(V, _LANE)
    bn, Np, grid_n = _block_params(N, block_n)

    table_p = _pad_table(table, Vp)
    idx_p = _pad_rows(idx.reshape(N), Np)
    tgt_p = _pad_rows(targets.reshape(N), Np)

    row_spec = pl.BlockSpec((bn, 1), lambda i: (i, 0))
    table_spec = pl.BlockSpec((Vp, Vp), lambda i: (0, 0))
    loss_spec = pl.BlockSpec((_SUBLANE, _LANE), lambda i: (i, 0))

    loss_tiles = pl.pallas_call(
        functools.partial(_loss_only_kernel, n_valid=N),
        out_shape=jax.ShapeDtypeStruct((grid_n * _SUBLANE, _LANE), jnp.float32),
        grid=(grid_n,),
        in_specs=[row_spec, row_spec, table_spec],
        out_specs=loss_spec,
        compiler_params=_compiler_params(),
    )(idx_p, tgt_p, table_p)

    block_sums = loss_tiles.reshape(grid_n, _SUBLANE, _LANE)[:, 0, 0]
    return jnp.sum(block_sums) / jnp.float32(N)


def _reference_forward(idx, table, targets):
    # Pure-JAX reference matching torch semantics.
    logits = table[idx]                                    # (B, T, V)
    B, T, C = logits.shape
    lf = logits.reshape(B * T, C)
    tf = targets.reshape(B * T)
    lse = jax.scipy.special.logsumexp(lf, axis=-1)
    picked = jnp.take_along_axis(lf, tf[:, None], axis=-1)[:, 0]
    loss = jnp.mean(lse - picked)
    return logits, loss


if __name__ == "__main__":
    key = jax.random.PRNGKey(0)
    vocab_size = 65   # e.g. character-level charset size
    B, T = 2, 8

    k_table, k_idx, k_tgt = jax.random.split(key, 3)
    # nn.Embedding default init: N(0, 1)
    table = jax.random.normal(k_table, (vocab_size, vocab_size), dtype=jnp.float32)
    idx = jax.random.randint(k_idx, (B, T), 0, vocab_size, dtype=jnp.int32)
    targets = jax.random.randint(k_tgt, (B, T), 0, vocab_size, dtype=jnp.int32)

    ref_logits, ref_loss = _reference_forward(idx, table, targets)

    # Training path (logits + loss).
    logits, loss = bigram_forward(idx, table, targets)
    logits = jax.block_until_ready(logits)
    loss = jax.block_until_ready(loss)
    assert logits.shape == (B, T, vocab_size)
    assert jnp.allclose(logits, ref_logits, atol=1e-5, rtol=1e-5)
    assert jnp.allclose(loss, ref_loss, atol=1e-4, rtol=1e-4)

    # Loss-only fast path (no logits materialization).
    loss_only = jax.block_until_ready(bigram_loss(idx, table, targets))
    assert jnp.allclose(loss_only, ref_loss, atol=1e-4, rtol=1e-4)

    # Padded-vocab path: no narrowing copy; padded columns ~ -inf.
    logits_pad, loss_pad = bigram_forward(idx, table, targets, pad_vocab=True)
    logits_pad = jax.block_until_ready(logits_pad)
    assert logits_pad.shape == (B, T, 128)
    assert jnp.allclose(logits_pad[..., :vocab_size], ref_logits, atol=1e-5, rtol=1e-5)
    assert bool(jnp.all(logits_pad[..., vocab_size:] < -1e29))
    assert jnp.allclose(loss_pad, ref_loss, atol=1e-4, rtol=1e-4)

    # Inference path (targets=None -> loss is None), like the torch module.
    logits_only, loss_none = bigram_forward(idx, table, None)
    logits_only = jax.block_until_ready(logits_only)
    assert loss_none is None
    assert jnp.allclose(logits_only, ref_logits, atol=1e-5, rtol=1e-5)

    # TODO(synk): generate() (autoregressive multinomial sampling loop) is
    # host-side control flow, not a kernel hot path; not implemented here.

    print("KERNEL_OK")
</pallas_src>

<mosaic_0001>
module attributes {stable_mosaic.version = 11 : i64} {
  func.func @_logits_loss_kernel(%arg0: i32, %arg1: memref<8x1xi32, #tpu.memory_space<vmem>>, %arg2: memref<8x1xi32, #tpu.memory_space<vmem>>, %arg3: memref<128x128xf32, #tpu.memory_space<vmem>>, %arg4: memref<8x128xf32, #tpu.memory_space<vmem>>, %arg5: memref<8x128xf32, #tpu.memory_space<vmem>>) attributes {dimension_semantics = [#tpu.dimension_semantics<parallel>], iteration_bounds = array<i64: 2>, scalar_prefetch = 0 : i64, scratch_operands = 0 : i64, tpu.core_type = #tpu.core_type<tc>, window_params = [{transform_indices = @transform_0, window_bounds = array<i64: 8, 1>}, {transform_indices = @transform_1, window_bounds = array<i64: 8, 1>}, {pipeline_mode = #tpu.pipeline_mode<synchronous>, transform_indices = @transform_2, window_bounds = array<i64: 128, 128>}, {transform_indices = @transform_3, window_bounds = array<i64: 8, 128>}, {transform_indices = @transform_4, window_bounds = array<i64: 8, 128>}]} {
    %c0 = arith.constant 0 : index
    %c0_0 = arith.constant 0 : index
    %0 = vector.load %arg1[%c0, %c0_0] : memref<8x1xi32, #tpu.memory_space<vmem>>, vector<8x1xi32>
    %1 = tpu.iota {dimensions = array<i32: 1>} : vector<8x128xi32>
    %2 = vector.broadcast %0 : vector<8x1xi32> to vector<8x128xi32>
    %3 = arith.cmpi eq, %2, %1 : vector<8x128xi32>
    %4 = arith.extui %3 : vector<8x128xi1> to vector<8x128xi32>
    %5 = arith.sitofp %4 : vector<8x128xi32> to vector<8x128xf32>
    %c0_1 = arith.constant 0 : index
    %c0_2 = arith.constant 0 : index
    %6 = vector.load %arg3[%c0_1, %c0_2] : memref<128x128xf32, #tpu.memory_space<vmem>>, vector<128x128xf32>
    %cst = arith.constant dense<0.000000e+00> : vector<8x128xf32>
    %7 = tpu.matmul %5, %6, %cst {dimension_numbers = #tpu.dot_dimension_numbers<[1], [0], [0], [1], [0, 0, 1, 1], [], []>, precision = #tpu.contract_precision<fp32>} : vector<8x128xf32>, vector<128x128xf32>, vector<8x128xf32> -> vector<8x128xf32>
    %c0_3 = arith.constant 0 : index
    %c0_4 = arith.constant 0 : index
    %8 = vector.load %arg4[%c0_3, %c0_4] : memref<8x128xf32, #tpu.memory_space<vmem>>, vector<8x128xf32>
    tpu.vector_store %arg4[%c0_3, %c0_4], %7 {strides = array<i32>} : memref<8x128xf32, #tpu.memory_space<vmem>>, vector<8x128xf32>,
    %c0_5 = arith.constant 0 : index
    %c0_6 = arith.constant 0 : index
    %9 = vector.load %arg2[%c0_5, %c0_6] : memref<8x1xi32, #tpu.memory_space<vmem>>, vector<8x1xi32>
    %c8_i32 = arith.constant 8 : i32
    %10 = arith.muli %arg0, %c8_i32 : i32
    %cst_7 = arith.constant dense<0xFF800000> : vector<8xf32>
    %11 = vector.multi_reduction <maximumf>, %7, %cst_7 [1] : vector<8x128xf32> to vector<8xf32>
    %12 = vector.shape_cast %11 : vector<8xf32> to vector<8x1xf32>
    %13 = vector.broadcast %12 : vector<8x1xf32> to vector<8x128xf32>
    %14 = arith.subf %7, %13 : vector<8x128xf32>
    %15 = math.exp %14 : vector<8x128xf32>
    %cst_8 = arith.constant dense<0.000000e+00> : vector<8xf32>
    %16 = vector.multi_reduction <add>, %15, %cst_8 [1] : vector<8x128xf32> to vector<8xf32>
    %17 = vector.shape_cast %16 : vector<8xf32> to vector<8x1xf32>
    %18 = math.log %17 : vector<8x1xf32>
    %19 = arith.addf %12, %18 : vector<8x1xf32>
    %20 = vector.broadcast %9 : vector<8x1xi32> to vector<8x128xi32>
    %21 = arith.cmpi eq, %20, %1 : vector<8x128xi32>
    %cst_9 = arith.constant 0.000000e+00 : f32
    %22 = vector.broadcast %cst_9 : f32 to vector<8x128xf32>
    %23 = arith.select %21, %7, %22 : vector<8x128xi1>, vector<8x128xf32>
    %cst_10 = arith.constant dense<0.000000e+00> : vector<8xf32>
    %24 = vector.multi_reduction <add>, %23, %cst_10 [1] : vector<8x128xf32> to vector<8xf32>
    %25 = vector.shape_cast %24 : vector<8xf32> to vector<8x1xf32>
    %26 = arith.subf %19, %25 : vector<8x1xf32>
    %27 = tpu.iota {dimensions = array<i32: 0>} : vector<8x1xi32>
    %28 = vector.broadcast %10 : i32 to vector<8x1xi32>
    %29 = arith.addi %28, %27 : vector<8x1xi32>
    %c16_i32 = arith.constant 16 : i32
    %30 = vector.broadcast %c16_i32 : i32 to vector<8x1xi32>
    %31 = arith.cmpi slt, %29, %30 : vector<8x1xi32>
    %cst_11 = arith.constant 0.000000e+00 : f32
    %32 = vector.broadcast %cst_11 : f32 to vector<8x1xf32>
    %33 = arith.select %31, %26, %32 : vector<8x1xi1>, vector<8x1xf32>
    %cst_12 = arith.constant dense<0.000000e+00> : vector<1xf32>
    %34 = vector.multi_reduction <add>, %33, %cst_12 [0] : vector<8x1xf32> to vector<1xf32>
    %35 = vector.shape_cast %34 : vector<1xf32> to vector<1x1xf32>
    %36 = vector.shape_cast %35 : vector<1x1xf32> to vector<1x1xf32>
    %37 = vector.broadcast %36 : vector<1x1xf32> to vector<8x128xf32>
    %c0_13 = arith.constant 0 : index
    %c0_14 = arith.constant 0 : index
    %38 = vector.load %arg5[%c0_13, %c0_14] : memref<8x128xf32, #tpu.memory_space<vmem>>, vector<8x128xf32>
    tpu.vector_store %arg5[%c0_13, %c0_14], %37 {strides = array<i32>} : memref<8x128xf32, #tpu.memory_space<vmem>>, vector<8x128xf32>,
    return
  }
  func.func @transform_0(%arg0: i32) -> (i32, i32) {
    %c0_i32 = arith.constant 0 : i32
    %c0_i32_0 = arith.constant 0 : i32
    return %arg0, %c0_i32 : i32, i32
  }
  func.func @transform_1(%arg0: i32) -> (i32, i32) {
    %c0_i32 = arith.constant 0 : i32
    %c0_i32_0 = arith.constant 0 : i32
    return %arg0, %c0_i32 : i32, i32
  }
  func.func @transform_2(%arg0: i32) -> (i32, i32) {
    %c0_i32 = arith.constant 0 : i32
    %c0_i32_0 = arith.constant 0 : i32
    %c0_i32_1 = arith.constant 0 : i32
    return %c0_i32, %c0_i32_0 : i32, i32
  }
  func.func @transform_3(%arg0: i32) -> (i32, i32) {
    %c0_i32 = arith.constant 0 : i32
    %c0_i32_0 = arith.constant 0 : i32
    return %arg0, %c0_i32 : i32, i32
  }
  func.func @transform_4(%arg0: i32) -> (i32, i32) {
    %c0_i32 = arith.constant 0 : i32
    %c0_i32_0 = arith.constant 0 : i32
    return %arg0, %c0_i32 : i32, i32
  }
}

</mosaic_0001>

<bundles_post_ra>
// kernel: tpu_custom_call.1
= control target key start
LH: loop header
LB: loop body
LE: loop exit
PB: predicated region body
PF: predicated region fallthrough
CT: control target
= control target key end

     0   :  { %10 = vsyncpa [#allocation3], 0  ;;  %s2301_s0 = inlined_call_operand.vmem [shape: s32[16,1], index: 0, kind: input, shape index: {}]   ;;  %s2302_s1 = inlined_call_operand.vmem [shape: s32[16,1], index: 1, kind: input, shape index: {}]   ;;  %s2303_s2 = inlined_call_operand.hbm [shape: f32[128,128], index: 2, kind: input, shape index: {}]   ;;  %s2304_s3 = inlined_call_operand.hbm [shape: f32[16,128], index: 3, kind: output, shape index: {0}]   ;;  %s2305_s4 = inlined_call_operand.hbm [shape: f32[16,128], index: 4, kind: output, shape index: {1}]  }
   0x1   :  { %11 = vsyncpa [#allocation4], 0 }
   0x2   :  { %13 = vsyncpa [#allocation4 + $0x1], 0 }
   0x3   :  { %14 = vsyncpa [#allocation7], 0 }
   0x4   :  { %16 = vsyncpa [#allocation7 + $0x1], 0  ;;  %s1800_s15 = smov 0   ;;  %s1802_s16 = smov 0  }
   0x5   :  { %s1804_s17 = smov 0   ;;  %s1806_s18 = smov 0  }
   0x6 LB: > { %s1821_s19 = sadd.s32 4294967295, %s1763_s18   ;;  %s1083_s20 = sadd.s32 4294967294, %s1763_s18   ;;  %s1763_s18 = sphi %s1806_s18, %s2321_s18   ;;  %s1759_s17 = sphi %s1804_s17, %s2320_s17   ;;  %s1755_s16 = sphi %s1802_s16, %s2319_s16   ;;  %s1751_s15 = sphi %s1800_s15, %s2318_s15  }
   0x7   : > { %s1825_s21 = sadd.s32 1, %s1763_s18   ;;  %s102_s22 = sadd.s32 1, %s1759_s17 }
   0x8   : > { %s99_s23 = ssub.s32 %s1763_s18, %s1825_s21  ;;  %p112_p0 = scmp.ne.s32.totalorder %s1759_s17, %s1755_s16 }
   0x9   : > { %p100_p1 = scmp.eq.s32.totalorder %s99_s23, 0  ;;  %p113_p2 = scmp.eq.s32.totalorder %s1821_s19, 1 }
   0xa   : > { %p118_p3 = scmp.ne.s32.totalorder %s1755_s16, %s1751_s15  ;;  %p119_p4 = scmp.eq.s32.totalorder %s1083_s20, 1 }
   0xb   : > { %s1836_s24 = scalar_select %p100_p1, %s1759_s17, %s102_s22  }
   0xc   : > { %p1838_p5 = por %p113_p2, %p112_p0  ;;  %p1842_p6 = por %p119_p4, %p118_p3 }
   0xd   : > { %p1084_p7 = scmp.ge.s32.totalorder %s1763_s18, 1  ;;  %p152_p8 = scmp.lt.s32.totalorder %s1763_s18, 3 }
   0xe   : > { %s2309_s25 = scalar_select %p1838_p5, 1, 0 }
   0xf   : > { %s2310_s26 = scalar_select %p1842_p6, 1, 0 }
  0x10   : > { %p2306_p9 = scmp.eq.s32.totalorder %s1821_s19, 0  ;;  %p1849_p10 = pnand %p1084_p7, %p152_p8 }
  0x11   : > { %s1765_s28 = smov [#allocation2]   ;;  %s1637_s7 = scalar_lea.hbm %s2303_s2, 2048 }
  0x12   : > { %s2311_s27 = scalar_select %p1849_p10, 1, 0 }
  0x13   : > { %s164_s29 = sshll.u32 %s1765_s28, 4  ;;  %p1577_p11 = pneg %p1849_p10  ;;  %s165_s29 = int_to_ptr.vmem [resolvable:$true] %s164_s29 }
  0x14   : > { %p1638_p13 = scmp.ne.s32.totalorder %s2303_s2, %s1637_s7  ;;  %p1644_p3 = scmp.lt.u32.totalorder %s1637_s7, %s2303_s2 }
  0x15   : > { %p1857_p12 = pnand %p2306_p9, %p1577_p11 }
  0x17   : > { %p1639_p0 = pneg %p1857_p12 }
  0x19   : > { %p1640_p1 = pnand %p1639_p0, %p1638_p13 }
  0x1b   : > { %p1641_p2 = pneg %p1640_p1 }
  0x1d   : > { %p1646_p4 = pnand %p1644_p3, %p1641_p2 }
  0x1f   : > { %1649 = shalt.err (!%p1646_p4)
}
  0x20   : > { %s1650_s12 = scalar_lea.vmem %s165_s29, 2048  ;;  %p1658_p9 = scmp.lt.s32.totalorder %s165_s29, %s165_s29 }
  0x21   : > { %p1651_p7 = scmp.ne.s32.totalorder %s165_s29, %s1650_s12  ;;  %p1659_p6 = scmp.lt.s32.totalorder %s1650_s12, %s1650_s12 }
  0x23   : > { %p1653_p8 = pnand %p1651_p7, %p1639_p0  ;;  %p1660_p5 = por %p1659_p6, %p1658_p9 }
  0x25   : > { %p1654_p11 = pneg %p1653_p8 }
  0x27   : > { %p1661_p10 = pnand %p1660_p5, %p1654_p11 }
  0x29   : > { %1664 = shalt.err (!%p1661_p10)
}
  0x2a   : > { %s1766_s13 = smov 128   ;;  %s1767_s14 = smov 8  }
  0x2b   : > { %1580 = dma.hbm_to_vmem [thread:$0]  (!%p1857_p12), %s2303_s2, 2048, %s165_s29, [#allocation3], %s1766_s13, %s1766_s13, %s1767_s14  }
  0x2c   : > { %p2313_p13 = scmp.ne.s32.totalorder %s2311_s27, 0 }
  0x2d   : > { %p2314_p1 = scmp.eq.s32.totalorder (!%p2313_p13), %s1821_s19, 0 }
  0x2e   : > { %194 = sbr.rel (%p2313_p13) target bundleno = 820 (0x334), region = 32 }
  0x35   : > { %1738 = dma.done.wait (%p2314_p1), [#allocation3], 2048   ;;  %p2315_p0 = pmov %p2314_p1 }
  0x36   : > { %p228_p5 = scmp.lt.s32.totalorder %s1821_s19, 1  ;;  %v1768_v0 = vmov 0   ;;  %v1769_v1 = vmov 0.0|0.0   ;;  %v245_v3 = vld [vmem:[#allocation2] sm:$0xff]  ;;  %v246_v4 = vld [vmem:[#allocation2 + $0x8] sm:$0xff]  ;;  %v247_v7 = vld [vmem:[#allocation2 + $0x10] sm:$0xff] }
  0x37   : > { %1740 = vsyncadd (%p2315_p0), [#allocation3], 4294965248  ;;  %1631 = vset.pattern.permute.xlu0 %v1768_v0  ;;  %1488 = vmatprep.subr.bf16.mxu0 %v1769_v1  ;;  %v262_v5 = vand.u32 4294901760, %v245_v3  ;;  %v265_v6 = vand.u32 4294901760, %v246_v4  ;;  %v248_v8 = vld [vmem:[#allocation2 + $0x18] sm:$0xff]  ;;  %v249_v9 = vld [vmem:[#allocation2 + $0x20] sm:$0xff] }
  0x38   : > { %s1886_s23 = scalar_select %p228_p5, %s1821_s19, 1  ;;  %1416 = vmatprep.subr.bf16.mxu1 %v1769_v1  ;;  %1632 = vset.pattern.permute.xlu1 %v1768_v0  ;;  %v268_v10 = vand.u32 4294901760, %v247_v7  ;;  %v271_v11 = vand.u32 4294901760, %v248_v8  ;;  %v250_v12 = vld [vmem:[#allocation2 + $0x28] sm:$0xff]  ;;  %v274_v13 = vand.u32 4294901760, %v249_v9  ;;  %v251_v14 = vld [vmem:[#allocation2 + $0x30] sm:$0xff] }
  0x39   : > { %v252_v15 = vld [vmem:[#allocation2 + $0x38] sm:$0xff]  ;;  %v1895_v16 = vpack.c.bf16 %v265_v6, %v262_v5  ;;  %v1897_v17 = vsub.f32 %v245_v3, %v262_v5  ;;  %v1899_v18 = vsub.f32 %v246_v4, %v265_v6  ;;  %v277_v19 = vand.u32 4294901760, %v250_v12  ;;  %v1901_v20 = vld [vmem:[#allocation2 + $0x40] sm:$0xff]  ;;  %v1903_v21 = vld [vmem:[#allocation2 + $0x48] sm:$0xff]  ;;  %s2217_s8 = sand.u32 1, %s1755_s16   ;;  %s1100_s11 = sshll.u32 %s1821_s19, 7 }
  0x3a   : > { %s1091_s27 = sshll.u32 %s1886_s23, 3  ;;  %v1905_v22 = vld [vmem:[#allocation2 + $0x50] sm:$0xff]  ;;  %v1907_v23 = vsub.f32 %v247_v7, %v268_v10  ;;  %v1909_v24 = vsub.f32 %v248_v8, %v271_v11  ;;  %v1911_v25 = vsub.f32 %v249_v9, %v274_v13  ;;  %v1913_v26 = vld [vmem:[#allocation2 + $0x58] sm:$0xff]  ;;  %v1915_v27 = vld [vmem:[#allocation2 + $0x60] sm:$0xff]  ;;  %v1919_v28 = vpack.c.bf16 %v271_v11, %v268_v10  ;;  %s1089_s9 = sshll.u32 %s2217_s8, 3 }
  0x3b   : > { %s231_s30 = scalar_lea.vmem %s2301_s0, %s1091_s27  ;;  %1490 = vmatpush3.bf16.msra.mxu0 %v1895_v16  ;;  %1418 = vmatpush3.bf16.msra.mxu1 %v1895_v16  ;;  %v1921_v29 = vsub.f32 %v250_v12, %v277_v19  ;;  %v280_v30 = vand.u32 4294901760, %v251_v14  ;;  %v283_v31 = vand.u32 4294901760, %v252_v15  ;;  %v286_v32 = vand.u32 4294901760, %v1901_v20  ;;  %v1928_v35 = vld [vmem:[#allocation2 + $0x68] sm:$0xff]  ;;  %v1936_v40 = vld [vmem:[#allocation2 + $0x70] sm:$0xff]  ;;  %v1938_v41 = vld [vmem:[#allocation2 + $0x78] sm:$0xff]  ;;  %s235_s7 = scalar_lea.vmem %s2302_s1, %s1091_s27 }
  0x3c   : > { %v236_v2 = vld [vmem:[%s231_s30] sm:$0xff]  ;;  %1491 = vmatprep.subr.bf16.mxu0 %v1769_v1  ;;  %1419 = vmatprep.subr.bf16.mxu1 %v1769_v1  ;;  %v289_v33 = vand.u32 4294901760, %v1903_v21  ;;  %v292_v34 = vand.u32 4294901760, %v1905_v22  ;;  %v295_v38 = vand.u32 4294901760, %v1913_v26  ;;  %v298_v39 = vand.u32 4294901760, %v1915_v27  ;;  %s220_s10 = scalar_lea.vmem [#allocation5], %s1089_s9  ;;  %s2229_s14 = scalar_lea.hbm %s2304_s3, %s1100_s11 }
  0x3d   : > { %240 = vperm.xlu0 %1631, %v236_v2   ;;  %v1930_v36 = vsub.f32 %v251_v14, %v280_v30  ;;  %v1932_v37 = vsub.f32 %v252_v15, %v283_v31  ;;  %v1940_v42 = vpack.c.bf16 %v277_v19, %v274_v13  ;;  %v1943_v43 = vsub.f32 %v1901_v20, %v286_v32  ;;  %s955_s20 = sshll.u32 %s220_s10, 4  ;;  %s937_s22 = scalar_lea.sflag [#allocation4], %s2217_s8  ;;  %s956_s20 = int_to_ptr.vmem [resolvable:$true] %s955_s20 }
  0x3e   : > { %v1946_v44 = vsub.f32 %v1903_v21, %v289_v33  ;;  %v1953_v45 = vsub.f32 %v1905_v22, %v292_v34  ;;  %v1958_v46 = vsub.f32 %v1913_v26, %v295_v38  ;;  %v301_v47 = vand.u32 4294901760, %v1928_v35  ;;  %s1665_s23 = scalar_lea.vmem %s956_s20, 128  ;;  %p2316_p9 = scmp.ne.s32.totalorder %s2309_s25, 0 }
  0x3f   : > { %1493 = vmatpush3.bf16.msra.mxu0 %v1919_v28  ;;  %1421 = vmatpush3.bf16.msra.mxu1 %v1919_v28  ;;  %v1964_v48 = vsub.f32 %v1915_v27, %v298_v39  ;;  %v304_v49 = vand.u32 4294901760, %v1936_v40  ;;  %v307_v50 = vand.u32 4294901760, %v1938_v41  ;;  %v355_v51 = vand.u32 4294901760, %v1897_v17  ;;  %p1666_p6 = scmp.ne.s32.totalorder %s956_s20, %s1665_s23  ;;  %s1773_s27 = smov [#allocation5]  }
  0x40   : > { %1494 = vmatprep.subr.bf16.mxu0 %v1769_v1  ;;  %1422 = vmatprep.subr.bf16.mxu1 %v1769_v1  ;;  %v1974_v52 = vsub.f32 %v1928_v35, %v301_v47  ;;  %vm1770_vm0 = vmmov 0   ;;  %v1771_v53 = vmov 0.0   ;;  %v362_v54 = vand.u32 4294901760, %v1899_v18  ;;  %s1669_s28 = sshll.u32 %s1773_s27, 4  ;;  %s1670_s28 = int_to_ptr.vmem [resolvable:$false] %s1669_s28 }
  0x41   : > { %1343 = vmatprep.mubr.msk.f32.mxu0 %vm1770_vm0, %v1771_v53  ;;  %1238 = vmatprep.mubr.msk.f32.mxu1 %vm1770_vm0, %v1771_v53  ;;  %v369_v55 = vand.u32 4294901760, %v1907_v23  ;;  %v1982_v56 = vpack.c.bf16 %v283_v31, %v280_v30  ;;  %v1987_v57 = vsub.f32 %v1936_v40, %v304_v49  ;;  %v1992_v58 = vsub.f32 %v1938_v41, %v307_v50  ;;  %p1667_p10 = pnand %p1666_p6, %p2316_p9  ;;  %s1671_s29 = scalar_lea.vmem %s1670_s28, 256 }
  0x42   : > { %v356_v59 = vsub.f32 %v1897_v17, %v355_v51  ;;  %v1997_v60 = vpack.c.bf16 %v362_v54, %v355_v51  ;;  %v363_v61 = vsub.f32 %v1899_v18, %v362_v54  ;;  %v376_v62 = vand.u32 4294901760, %v1909_v24  ;;  %p1672_p2 = scmp.lt.s32.totalorder %s956_s20, %s1670_s28  ;;  %p1673_p3 = scmp.lt.s32.totalorder %s1671_s29, %s1665_s23 }
  0x43   : > { %1496 = vmatpush3.bf16.msra.mxu0 %v1940_v42  ;;  %1424 = vmatpush3.bf16.msra.mxu1 %v1940_v42  ;;  %v370_v63 = vsub.f32 %v1907_v23, %v369_v55  ;;  %v383_v2 = vand.u32 4294901760, %v1911_v25  ;;  %v390_v3 = vand.u32 4294901760, %v1921_v29  ;;  %v397_v11 = vand.u32 4294901760, %v1930_v36  ;;  %p1668_p12 = pneg %p1667_p10 }
  0x44   : > { %1497 = vmatprep.subr.bf16.mxu0 %v1769_v1  ;;  %1425 = vmatprep.subr.bf16.mxu1 %v1769_v1  ;;  %v357_v0 = vand.u32 4294901760, %v356_v59  ;;  %v364_v4 = vand.u32 4294901760, %v363_v61  ;;  %v2006_v5 = vpack.c.bf16 %v376_v62, %v369_v55  ;;  %v377_v7 = vsub.f32 %v1909_v24, %v376_v62  ;;  %p1674_p4 = por %p1673_p3, %p1672_p2 }
  0x45   : > { %v371_v6 = vand.u32 4294901760, %v370_v63  ;;  %v2009_v8 = vpack.c.bf16 %v390_v3, %v383_v2  ;;  %v384_v9 = vsub.f32 %v1911_v25, %v383_v2  ;;  %v391_v10 = vsub.f32 %v1921_v29, %v390_v3 }
  0x46   : > { %v2016_v12 = vpack.c.bf16 %v289_v33, %v286_v32  ;;  %v2018_v13 = vpack.c.bf16 %v364_v4, %v357_v0  ;;  %v378_v14 = vand.u32 4294901760, %v377_v7  ;;  %v404_v15 = vand.u32 4294901760, %v1932_v37  ;;  %p1675_p7 = pnand %p1674_p4, %p1668_p12 }
  0x47   : > { %1499 = vmatpush3.bf16.msra.mxu0 %v1982_v56  ;;  %1427 = vmatpush3.bf16.msra.mxu1 %v1982_v56  ;;  %v385_v19 = vand.u32 4294901760, %v384_v9  ;;  %v392_v20 = vand.u32 4294901760, %v391_v10  ;;  %v398_v21 = vsub.f32 %v1930_v36, %v397_v11  ;;  %v411_v54 = vand.u32 4294901760, %v1943_v43 }
  0x48   : > { %1500 = vmatprep.subr.bf16.mxu0 %v1769_v1  ;;  %1428 = vmatprep.subr.bf16.mxu1 %v1769_v1  ;;  %v2024_v30 = vpack.c.bf16 %v378_v14, %v371_v6  ;;  %v2026_v31 = vpack.c.bf16 %v404_v15, %v397_v11  ;;  %v405_v32 = vsub.f32 %v1932_v37, %v404_v15  ;;  %v418_v55 = vand.u32 4294901760, %v1946_v44 }
  0x49   : > { %v2029_v33 = vpack.c.bf16 %v392_v20, %v385_v19  ;;  %v399_v51 = vand.u32 4294901760, %v398_v21  ;;  %v2039_v59 = vpack.c.bf16 %v295_v38, %v292_v34  ;;  %v412_v63 = vsub.f32 %v1943_v43, %v411_v54 }
  0x4a   : > { %v406_v61 = vand.u32 4294901760, %v405_v32  ;;  %v2043_v62 = vpack.c.bf16 %v418_v55, %v411_v54  ;;  %v419_v0 = vsub.f32 %v1946_v44, %v418_v55  ;;  %v425_v22 = vand.u32 4294901760, %v1953_v45 }
  0x4b   : > { %1502 = vmatpush3.bf16.msra.mxu0 %v2016_v12  ;;  %1430 = vmatpush3.bf16.msra.mxu1 %v2016_v12  ;;  %v413_v3 = vand.u32 4294901760, %v412_v63  ;;  %v432_v26 = vand.u32 4294901760, %v1958_v46  ;;  %v2057_v34 = vpack.c.bf16 %v301_v47, %v298_v39  ;;  %v439_v11 = vand.u32 4294901760, %v1964_v48 }
  0x4c   : > { %1503 = vmatprep.subr.bf16.mxu0 %v1769_v1  ;;  %1431 = vmatprep.subr.bf16.mxu1 %v1769_v1  ;;  %v2047_v2 = vpack.c.bf16 %v406_v61, %v399_v51  ;;  %v420_v4 = vand.u32 4294901760, %v419_v0  ;;  %v426_v7 = vsub.f32 %v1953_v45, %v425_v22  ;;  %v446_v27 = vand.u32 4294901760, %v1974_v52 }
  0x4d   : > { %v2063_v6 = vpack.c.bf16 %v432_v26, %v425_v22  ;;  %v433_v9 = vsub.f32 %v1958_v46, %v432_v26  ;;  %v2075_v35 = vpack.c.bf16 %v307_v50, %v304_v49  ;;  %v440_v14 = vsub.f32 %v1964_v48, %v439_v11 }
  0x4e   : > { %v2061_v38 = vpack.c.bf16 %v420_v4, %v413_v3  ;;  %v427_v10 = vand.u32 4294901760, %v426_v7  ;;  %v2079_v47 = vpack.c.bf16 %v446_v27, %v439_v11  ;;  %v447_v15 = vsub.f32 %v1974_v52, %v446_v27 }
  0x4f   : > { %1505 = vmatpush3.bf16.msra.mxu0 %v2039_v59  ;;  %1433 = vmatpush3.bf16.msra.mxu1 %v2039_v59  ;;  %v434_v39 = vand.u32 4294901760, %v433_v9  ;;  %v441_v20 = vand.u32 4294901760, %v440_v14  ;;  %v453_v40 = vand.u32 4294901760, %v1987_v57  ;;  %v460_v41 = vand.u32 4294901760, %v1992_v58 }
  0x50   : > { %1506 = vmatprep.subr.bf16.mxu0 %v1769_v1  ;;  %1434 = vmatprep.subr.bf16.mxu1 %v1769_v1  ;;  %v448_v21 = vand.u32 4294901760, %v447_v15  ;;  %v1465_v63 = vpack.c.bf16 %v1899_v18, %v1897_v17  ;;  %v1468_v0 = vpack.c.bf16 %v1909_v24, %v1907_v23  ;;  %v1471_v3 = vpack.c.bf16 %v1921_v29, %v1911_v25  ;;  %v903_v18 = vld [vmem:[%s235_s7] sm:$0xff] }
  0x51   : > { %v1456_v19 = vpack.c.bf16 %v434_v39, %v427_v10  ;;  %v1534_v50 = vpack.c.bf16 %v460_v41, %v453_v40  ;;  %v454_v32 = vsub.f32 %v1987_v57, %v453_v40  ;;  %v461_v51 = vsub.f32 %v1992_v58, %v460_v41  ;;  %916 = vperm.xlu1 %1632, %v903_v18  }
  0x52   : > { %v1459_v49 = vpack.c.bf16 %v448_v21, %v441_v20  ;;  %v1474_v4 = vpack.c.bf16 %v1932_v37, %v1930_v36  ;;  %v1477_v22 = vpack.c.bf16 %v1946_v44, %v1943_v43  ;;  %v1480_v26 = vpack.c.bf16 %v1958_v46, %v1953_v45 }
  0x53   : > { %1508 = vmatpush3.bf16.msra.mxu0 %v2057_v34  ;;  %1436 = vmatpush3.bf16.msra.mxu1 %v2057_v34  ;;  %v455_v54 = vand.u32 4294901760, %v454_v32  ;;  %v462_v55 = vand.u32 4294901760, %v461_v51  ;;  %v1483_v7 = vpack.c.bf16 %v1974_v52, %v1964_v48  ;;  %v1486_v17 = vpack.c.bf16 %v1992_v58, %v1987_v57 }
  0x54   : > { %1509 = vmatprep.subr.bf16.mxu0 %v1769_v1  ;;  %1437 = vmatprep.subr.bf16.mxu1 %v1769_v1  ;;  %v237_v9 = vlaneseq }
  0x55   : > { %v1462_v61 = vpack.c.bf16 %v462_v55, %v455_v54 }
  0x56   : > { %v2113_v10 = vand.u32 127, %v237_v9 }
  0x57   : > { %1511 = vmatpush3.bf16.msra.mxu0 %v2075_v35  ;;  %1439 = vmatpush3.bf16.msra.mxu1 %v2075_v35 }
  0x58   : > { %1512 = vmatprep.subr.bf16.mxu0 %v1769_v1  ;;  %1440 = vmatprep.subr.bf16.mxu1 %v1769_v1 }
  0xbc   : > { %v2115_v11 = vpop.permute.xlu0 %240 }
  0xbd   : > { %vm242_vm1 = vcmp.eq.s32.totalorder %v2115_v11, %v2113_v10 }
  0xbe   : > { %v1093_v27 = vsel %vm242_vm1, 1.0, %v1771_v53 }
  0xbf   : > { %v2123_v39 = vsub.f32 %v1093_v27, %v1093_v27 }
  0xc1   : > { %v344_v14 = vand.u32 4294901760, %v2123_v39 }
  0xc3   : > { %1344 = vmatmul.mubr.f32.vlgmr.msra.gmra.mrb[0].mxu0 %v344_v14  ;;  %v345_v15 = vsub.f32 %v2123_v39, %v344_v14 }
  0xc4   : > { %1514 = vmatpush3.bf16.msra.mxu0 %v1997_v60  ;;  %1378 = vmatprep.mubr.msk.f32.mxu0 %vm1770_vm0, %v1771_v53  ;;  %v1772_v60 = vmov 1.0  }
  0xc5   : > { %1515 = vmatprep.subr.bf16.mxu0 %v1769_v1  ;;  %v346_v20 = vand.u32 4294901760, %v345_v15 }
  0xc7   : > { %1239 = vmatmul.mubr.f32.vlgmr.msra.gmra.mrb[0].mxu1 %v346_v20 }
  0xc8   : > { %1442 = vmatpush3.bf16.msra.mxu1 %v2018_v13  ;;  %1517 = vmatpush3.bf16.msra.mxu0 %v2006_v5 }
  0xc9   : > { %1443 = vmatprep.subr.bf16.mxu1 %v1769_v1  ;;  %1518 = vmatprep.subr.bf16.mxu0 %v1769_v1 }
  0xca   : > { %1273 = vmatprep.mubr.msk.f32.mxu1 %vm1770_vm0, %v1771_v53 }
  0xcc   : > { %1445 = vmatpush3.bf16.msra.mxu1 %v2024_v30  ;;  %1520 = vmatpush3.bf16.msra.mxu0 %v2009_v8 }
  0xcd   : > { %1446 = vmatprep.subr.bf16.mxu1 %v1769_v1  ;;  %1521 = vmatprep.subr.bf16.mxu0 %v1769_v1 }
  0xd0   : > { %1448 = vmatpush3.bf16.msra.mxu1 %v2029_v33  ;;  %1523 = vmatpush3.bf16.msra.mxu0 %v2026_v31 }
  0xd1   : > { %1449 = vmatprep.subr.bf16.mxu1 %v1769_v1  ;;  %1524 = vmatprep.subr.bf16.mxu0 %v1769_v1 }
  0xd4   : > { %1451 = vmatpush3.bf16.msra.mxu1 %v2047_v2  ;;  %1526 = vmatpush3.bf16.msra.mxu0 %v2043_v62 }
  0xd5   : > { %1452 = vmatprep.subr.bf16.mxu1 %v1769_v1  ;;  %1527 = vmatprep.subr.bf16.mxu0 %v1769_v1 }
  0xd8   : > { %1454 = vmatpush3.bf16.msra.mxu1 %v2061_v38  ;;  %1529 = vmatpush3.bf16.msra.mxu0 %v2063_v6 }
  0xd9   : > { %1455 = vmatprep.subr.bf16.mxu1 %v1769_v1  ;;  %1530 = vmatprep.subr.bf16.mxu0 %v1769_v1 }
  0xdc   : > { %1457 = vmatpush3.bf16.msra.mxu1 %v1456_v19  ;;  %1532 = vmatpush3.bf16.msra.mxu0 %v2079_v47 }
  0xdd   : > { %1458 = vmatprep.subr.bf16.mxu1 %v1769_v1  ;;  %1533 = vmatprep.subr.bf16.mxu0 %v1769_v1 }
  0xe0   : > { %1460 = vmatpush3.bf16.msra.mxu1 %v1459_v49  ;;  %1535 = vmatpush3.bf16.msra.mxu0 %v1534_v50 }
  0xe1   : > { %1461 = vmatprep.subr.bf16.mxu1 %v1769_v1  ;;  %1536 = vmatprep.subr.bf16.mxu0 %v1769_v1 }
  0xe3   : > { %1379 = vmatmul.mubr.msk.f32.vlgmr.msra.gmra.mrb[0].mxu0 %vm242_vm1, %v1772_v60 }
  0xe4   : > { %1463 = vmatpush3.bf16.msra.mxu1 %v1462_v61  ;;  %1538 = vmatpush3.bf16.msra.mxu0 %v1895_v16 }
  0xe5   : > { %1464 = vmatprep.subr.bf16.mxu1 %v1769_v1  ;;  %1539 = vmatprep.subr.bf16.mxu0 %v1769_v1 }
  0xe6   : > { %1413 = vmatprep.mubr.msk.f32.mxu0 %vm1770_vm0, %v1771_v53 }
  0xe7   : > { %1274 = vmatmul.mubr.msk.f32.vlgmr.msra.gmra.mrb[0].mxu1 %vm242_vm1, %v1772_v60 }
  0xe8   : > { %1466 = vmatpush3.bf16.msra.mxu1 %v1465_v63  ;;  %1541 = vmatpush3.bf16.msra.mxu0 %v1919_v28 }
  0xe9   : > { %1467 = vmatprep.subr.bf16.mxu1 %v1769_v1  ;;  %1542 = vmatprep.subr.bf16.mxu0 %v1769_v1 }
  0xea   : > { %1308 = vmatprep.mubr.msk.f32.mxu1 %vm1770_vm0, %v1771_v53 }
  0xec   : > { %1469 = vmatpush3.bf16.msra.mxu1 %v1468_v0  ;;  %1544 = vmatpush3.bf16.msra.mxu0 %v1940_v42 }
  0xed   : > { %1470 = vmatprep.subr.bf16.mxu1 %v1769_v1  ;;  %1545 = vmatprep.subr.bf16.mxu0 %v1769_v1 }
  0xf0   : > { %1472 = vmatpush3.bf16.msra.mxu1 %v1471_v3  ;;  %1547 = vmatpush3.bf16.msra.mxu0 %v1982_v56 }
  0xf1   : > { %1473 = vmatprep.subr.bf16.mxu1 %v1769_v1  ;;  %1548 = vmatprep.subr.bf16.mxu0 %v1769_v1 }
  0xf4   : > { %1475 = vmatpush3.bf16.msra.mxu1 %v1474_v4  ;;  %1550 = vmatpush3.bf16.msra.mxu0 %v2016_v12 }
  0xf5   : > { %1476 = vmatprep.subr.bf16.mxu1 %v1769_v1  ;;  %1551 = vmatprep.subr.bf16.mxu0 %v1769_v1 }
  0xf8   : > { %1478 = vmatpush3.bf16.msra.mxu1 %v1477_v22  ;;  %1553 = vmatpush3.bf16.msra.mxu0 %v2039_v59 }
  0xf9   : > { %1479 = vmatprep.subr.bf16.mxu1 %v1769_v1  ;;  %1554 = vmatprep.subr.bf16.mxu0 %v1769_v1 }
  0xfc   : > { %1481 = vmatpush3.bf16.msra.mxu1 %v1480_v26  ;;  %1556 = vmatpush3.bf16.msra.mxu0 %v2057_v34 }
  0xfd   : > { %1482 = vmatprep.subr.bf16.mxu1 %v1769_v1  ;;  %1557 = vmatprep.subr.bf16.mxu0 %v1769_v1 }
 0x100   : > { %1484 = vmatpush3.bf16.msra.mxu1 %v1483_v7  ;;  %1559 = vmatpush3.bf16.msra.mxu0 %v2075_v35 }
 0x101   : > { %1485 = vmatprep.subr.bf16.mxu1 %v1769_v1  ;;  %v917_v1 = vpop.permute.xlu1 %916 }
 0x102   : > { %vm918_vm2 = vcmp.eq.s32.totalorder %v917_v1, %v2113_v10 }
 0x103   : > { %1414 = vmatmul.mubr.msk.f32.vlgmr.msra.gmra.mrb[0].mxu0 %vm242_vm1, %v1772_v60 }
 0x104   : > { %1487 = vmatpush3.bf16.msra.mxu1 %v1486_v17 }
 0x107   : > { %1309 = vmatmul.mubr.f32.vlgmr.msra.gmra.mrb[0].mxu1 %v2123_v39 }
 0x1d6   : > { %v898_v16 = vpop.f32.mrb[0].mxu0 }
 0x1d7   : > { %v1415_v23 = vpop.f32.mrb[1].mxu0 }
 0x1da   : > { %v603_v24 = vpop.f32.mrb[0].mxu1 }
 0x1db   : > { %v1560_v25 = vadd.f32 %v898_v16, %v603_v24  ;;  %v1310_v28 = vpop.f32.mrb[1].mxu1 }
 0x1dd   : > { %905 = vmax.xlane.f32.xlu0 %v1560_v25  ;;  %902 = vst [vmem:[%s220_s10] sm:$0xff] %v1560_v25  ;;  %v919_v29 = vsel %vm918_vm2, %v1560_v25, 0.0 }
 0x1e1   : > { %920 = vadd.xlane.f32.xlu0 %v919_v29 }
 0x26a   : > { %v906_v36 = vpop.xlane.xlu0 %905 }
 0x26b   : > { %v907_v37 = vsub.f32 %v1560_v25, %v906_v36 }
 0x26d   : > { %v908_v42 = vmul.f32 1.442695, %v907_v37 }
 0x26f   : > { %1633 = vpow2.f32 %v908_v42 }
 0x279   : > { %v1634_v43 = vpop.eup %1633 }
 0x27a   : > { %910 = vadd.xlane.f32.xlu1 %v1634_v43 }
 0x27b   : > { %1678 = shalt.err (!%p1675_p7)
}
 0x27c   : > { %s1679_s30 = scalar_lea.hbm %s2229_s14, 128  ;;  %s1683_s7 = scalar_lea.hbm %s2304_s3, 256 }
 0x27d   : > { %p1680_p8 = scmp.ne.s32.totalorder %s2229_s14, %s1679_s30  ;;  %p1684_p1 = scmp.lt.u32.totalorder %s2229_s14, %s2304_s3 }
 0x27e   : > { %p1685_p0 = scmp.lt.u32.totalorder %s1683_s7, %s1679_s30  ;;  %p1687_p6 = scmp.lt.u32.totalorder %s1679_s30, %s2229_s14 }
 0x27f   : > { %p1681_p11 = pnand %p1680_p8, %p2316_p9 }
 0x280   : > { %p1686_p5 = por %p1685_p0, %p1684_p1 }
 0x281   : > { %p1682_p13 = pneg %p1681_p11 }
 0x282   : > { %p1688_p10 = por %p1687_p6, %p1686_p5 }
 0x284   : > { %p1689_p12 = pnand %p1688_p10, %p1682_p13 }
 0x286   : > { %1692 = shalt.err (!%p1689_p12)
}
 0x287   : > { %1573 = dma.vmem_to_hbm [thread:$0]  (%p2316_p9), %s956_s20, 128, %s2229_s14, %s937_s22   ;;  %v924_v45 = vshrl.u32 %v237_v9, 7  ;;  %v921_v57 = vpop.xlane.xlu0 %920 }
 0x288   : > { %s1097_s13 = sshll.u32 %s1821_s19, 3  ;;  %s227_s14 = scalar_lea.vmem [#allocation6], %s1089_s9 }
 0x289   : > { %v925_v46 = vstv %s1097_s13  ;;  %s968_s20 = sshll.u32 %s227_s14, 4  ;;  %s2258_s27 = scalar_lea.hbm %s2305_s4, %s1100_s11  ;;  %s2260_s20 = int_to_ptr.vmem [resolvable:$true] %s968_s20 }
 0x28a   : > { %v926_v52 = vadd.s32 %v925_v46, %v924_v45  ;;  %s942_s28 = scalar_lea.sflag [#allocation7], %s2217_s8  ;;  %s1693_s29 = scalar_lea.vmem %s2260_s20, 128 }
 0x28b   : > { %p1694_p2 = scmp.ne.s32.totalorder %s2260_s20, %s1693_s29  ;;  %s1774_s9 = smov [#allocation6]  }
 0x28c   : > { %vm927_vm3 = vcmp.lt.s32.totalorder %v926_v52, 16  ;;  %s1697_s30 = sshll.u32 %s1774_s9, 4  ;;  %s1698_s30 = int_to_ptr.vmem [resolvable:$false] %s1697_s30 }
 0x28d   : > { %p1695_p3 = pnand %p1694_p2, %p2316_p9  ;;  %s1699_s19 = scalar_lea.vmem %s1698_s30, 256 }
 0x28e   : > { %p1700_p7 = scmp.lt.s32.totalorder %s2260_s20, %s1698_s30  ;;  %p1701_p8 = scmp.lt.s32.totalorder %s1699_s19, %s1693_s29 }
 0x28f   : > { %p1696_p4 = pneg %p1695_p3 }
 0x290   : > { %p1702_p11 = por %p1701_p8, %p1700_p7 }
 0x292   : > { %p1703_p13 = pnand %p1702_p11, %p1696_p4 }
 0x307   : > { %v911_v44 = vpop.xlane.xlu1 %910 }
 0x308   : > { %1635 = vlog2.f32 %v911_v44 }
 0x312   : > { %v1636_v48 = vpop.eup %1635 }
 0x313   : > { %v913_v53 = vmul.f32 0.6931472, %v1636_v48 }
 0x315   : > { %v914_v56 = vadd.f32 %v913_v53, %v906_v36 }
 0x317   : > { %v922_v58 = vsub.f32 %v914_v56, %v921_v57 }
 0x319   : > { %v928_v5 = vsel %vm927_vm3, %v922_v58, 0.0 }
 0x31a   : > { %v929_v8 = vrot.slane %v928_v5, 4 }
 0x31c   : > { %v930_v12 = vadd.f32 %v929_v8, %v928_v5 }
 0x31e   : > { %v931_v13 = vrot.slane %v930_v12, 2 }
 0x320   : > { %v932_v30 = vadd.f32 %v931_v13, %v930_v12 }
 0x322   : > { %v933_v31 = vrot.slane %v932_v30, 1 }
 0x324   : > { %v934_v33 = vadd.f32 %v933_v31, %v932_v30 }
 0x326   : > { %935 = vst [vmem:[%s227_s14] sm:$0xff] %v934_v33 }
 0x327   : > { %1706 = shalt.err (!%p1703_p13)
}
 0x328   : > { %s1707_s8 = scalar_lea.hbm %s2258_s27, 128  ;;  %s1711_s6 = scalar_lea.hbm %s2305_s4, 256 }
 0x329   : > { %p1708_p1 = scmp.ne.s32.totalorder %s2258_s27, %s1707_s8  ;;  %p1712_p6 = scmp.lt.u32.totalorder %s2258_s27, %s2305_s4 }
 0x32a   : > { %p1713_p10 = scmp.lt.u32.totalorder %s1711_s6, %s1707_s8  ;;  %p1715_p2 = scmp.lt.u32.totalorder %s1707_s8, %s2258_s27 }
 0x32b   : > { %p1709_p0 = pnand %p1708_p1, %p2316_p9 }
 0x32c   : > { %p1714_p12 = por %p1713_p10, %p1712_p6 }
 0x32d   : > { %p1710_p5 = pneg %p1709_p0 }
 0x32e   : > { %p1716_p3 = por %p1715_p2, %p1714_p12 }
 0x330   : > { %p1717_p4 = pnand %p1716_p3, %p1710_p5 }
 0x332   : > { %1720 = shalt.err (!%p1717_p4)
}
 0x333   : > { %1574 = dma.vmem_to_hbm [thread:$0]  (%p2316_p9), %s2260_s20, 128, %s2258_s27, %s942_s28  }
 0x334 PF: > { %p1590_p7 = scmp.ge.s32.totalorder %s1763_s18, 2  ;;  %s980_s12 = sand.u32 1, %s1751_s15  }
 0x335   : > { %p2317_p8 = scmp.ne.s32.totalorder %s2310_s26, 0  ;;  %s981_s13 = scalar_lea.sflag [#allocation4], %s980_s12 }
 0x337   : > { %p1582_p11 = pnand %p1590_p7, %p2317_p8 }
 0x339   : > { %1742 = dma.done.wait (!%p1582_p11), %s981_s13, 128  }
 0x33a   : > { %1744 = vsyncadd (!%p1582_p11), %s981_s13, 4294967168  ;;  %s990_s14 = scalar_lea.sflag [#allocation7], %s980_s12 }
 0x33b   : > { %1746 = dma.done.wait (!%p1582_p11), %s990_s14, 128  }
 0x33c   : > { %1748 = vsyncadd (!%p1582_p11), %s990_s14, 4294967168  ;;  %p19_p9 = scmp.ge.s32.totalorder %s1825_s21, 4   ;;  %s2318_s15 = smov %s1755_s16 }
 0x33d   : > { %s2319_s16 = smov %s1759_s17  ;;  %s2320_s17 = smov %s1836_s24 }
 0x33e   : > { %s2321_s18 = smov %s1825_s21  ;;  %21 = sbr.rel (!%p19_p9) target bundleno = 6 (0x6), region = 92 }
 0x345   :  { %995 = vsyncpa [#allocation3], 1 }
 0x346   :  { %997 = vsyncpa [#allocation3 + $0x1], 1 }
 0x347   :  { %998 = vsyncpa [#allocation4], 1 }
 0x348   :  { %1000 = vsyncpa [#allocation4 + $0x1], 1 }
 0x349   :  { %1001 = vsyncpa [#allocation7], 1 }
 0x34a   :  { %1003 = vsyncpa [#allocation7 + $0x1], 1 }

</bundles_post_ra>
